<compile_context>
chip_gen: v5e
topology: v5e:2x2
jax: 0.10.0
libtpu: 0.0.40
codegen_flags: <defaults>
</compile_context>

<pallas_src>
import jax
import jax.numpy as jnp
from jax.experimental import pallas as pl
from jax.experimental.pallas import tpu as pltpu

LANES = 128
SUBLANES = 8
MAX_COLS = 4096                    # cap on the lane-dense last dim
TILE_BYTES = 2 * 1024 * 1024       # per-tile budget (double-buffered in + out -> ~8 MiB)
VMEM_LIMIT = 32 * 1024 * 1024


# ------------------------------ Pallas kernel ------------------------------ #

def scale_kernel(x_ref, scale_ref, o_ref):
    # x_ref: (TM, C) VMEM tile; scale_ref: (1,) f32 in SMEM; o_ref: (TM, C).
    o_ref[...] = (x_ref[...] * scale_ref[0]).astype(o_ref.dtype)


# ------------------------------- JAX wrapper -------------------------------- #

def _lane_dense_shape(total):
    """(rows, cols) with cols a large multiple of 128 dividing `total`."""
    if total % LANES != 0:
        return 1, total                      # full-extent last dim (always legal)
    cols = LANES
    while cols * 2 <= MAX_COLS and total % (cols * 2) == 0:
        cols *= 2
    return total // cols, cols


def _pick_row_tile(rows, cols, itemsize):
    """Largest row tile: multiple of 8 dividing `rows`, within the VMEM budget."""
    if rows * cols * itemsize <= TILE_BYTES:
        return rows                          # whole slab in one block
    if rows % SUBLANES != 0:
        return rows                          # must use full extent to stay legal
    budget_rows = max(SUBLANES, TILE_BYTES // (cols * itemsize))
    tm = SUBLANES
    while tm * 2 <= budget_rows and rows % (tm * 2) == 0:
        tm *= 2
    return tm


def scale_forward(x, scale):
    """Equivalent of Scale.forward: input * scale (scale is a (1,) parameter)."""
    orig_shape = x.shape
    total = x.size
    rows, cols = _lane_dense_shape(total)
    x2 = x.reshape(rows, cols)
    itemsize = jnp.dtype(x.dtype).itemsize
    tm = _pick_row_tile(rows, cols, itemsize)

    out = pl.pallas_call(
        scale_kernel,
        out_shape=jax.ShapeDtypeStruct((rows, cols), x.dtype),
        grid=(rows // tm,),
        in_specs=[
            pl.BlockSpec((tm, cols), lambda i: (i, 0)),
            pl.BlockSpec(memory_space=pltpu.MemorySpace.SMEM),   # scalar param
        ],
        out_specs=pl.BlockSpec((tm, cols), lambda i: (i, 0)),
        compiler_params=pltpu.CompilerParams(
            dimension_semantics=("parallel",),       # megacore-shardable (v7x)
            vmem_limit_bytes=VMEM_LIMIT),
    )(x2, scale)
    return out.reshape(orig_shape)


# ---------------------------------- main ------------------------------------ #

if __name__ == "__main__":
    key = jax.random.PRNGKey(0)
    # Module: Scale(init_value=0.001) -> self.scale = Parameter([0.001])
    scale = jnp.array([0.001], dtype=jnp.float32)
    x = jax.random.normal(key, (2, 4, 16, 16), jnp.float32)

    out = scale_forward(x, scale)
    out = jax.block_until_ready(out)

    ref = x * scale[0]
    assert out.shape == x.shape
    assert bool(jnp.allclose(out, ref, rtol=1e-6, atol=1e-6))
    print("KERNEL_OK")
</pallas_src>

<mosaic_0001>
module attributes {stable_mosaic.version = 11 : i64} {
  func.func @scale_kernel(%arg0: i32, %arg1: memref<1x2048xf32, #tpu.memory_space<vmem>>, %arg2: memref<1xf32, #tpu.memory_space<smem>>, %arg3: memref<1x2048xf32, #tpu.memory_space<vmem>>) attributes {dimension_semantics = [#tpu.dimension_semantics<parallel>], iteration_bounds = array<i64: 1>, scalar_prefetch = 0 : i64, scratch_operands = 0 : i64, tpu.core_type = #tpu.core_type<tc>, window_params = [{transform_indices = @transform_0, window_bounds = array<i64: 1, 2048>}, {transform_indices = @transform_1, window_bounds = array<i64: 1>}, {transform_indices = @transform_2, window_bounds = array<i64: 1, 2048>}]} {
    %c0 = arith.constant 0 : index
    %c0_0 = arith.constant 0 : index
    %0 = vector.load %arg1[%c0, %c0_0] : memref<1x2048xf32, #tpu.memory_space<vmem>>, vector<1x2048xf32>
    %c0_1 = arith.constant 0 : index
    %1 = memref.load %arg2[%c0_1] : memref<1xf32, #tpu.memory_space<smem>>
    %2 = vector.broadcast %1 : f32 to vector<1x2048xf32>
    %3 = arith.mulf %0, %2 : vector<1x2048xf32>
    %c0_2 = arith.constant 0 : index
    %c0_3 = arith.constant 0 : index
    %4 = vector.load %arg3[%c0_2, %c0_3] : memref<1x2048xf32, #tpu.memory_space<vmem>>, vector<1x2048xf32>
    tpu.vector_store %arg3[%c0_2, %c0_3], %3 {strides = array<i32>} : memref<1x2048xf32, #tpu.memory_space<vmem>>, vector<1x2048xf32>,
    return
  }
  func.func @transform_0(%arg0: i32) -> (i32, i32) {
    %c0_i32 = arith.constant 0 : i32
    %c0_i32_0 = arith.constant 0 : i32
    return %arg0, %c0_i32 : i32, i32
  }
  func.func @transform_1(%arg0: i32) -> i32 {
    %c0_i32 = arith.constant 0 : i32
    %c0_i32_0 = arith.constant 0 : i32
    return %c0_i32 : i32
  }
  func.func @transform_2(%arg0: i32) -> (i32, i32) {
    %c0_i32 = arith.constant 0 : i32
    %c0_i32_0 = arith.constant 0 : i32
    return %arg0, %c0_i32 : i32, i32
  }
}

</mosaic_0001>

<bundles_post_ra>
// kernel: tpu_custom_call.1
= control target key start
LH: loop header
LB: loop body
LE: loop exit
PB: predicated region body
PF: predicated region fallthrough
CT: control target
= control target key end

     0   :  { %8 = vsyncpa [#allocation4], 0  ;;  %s132_s0 = inlined_call_operand.hbm [shape: f32[1,2048], index: 0, kind: input, shape index: {}]   ;;  %s133_s1 = inlined_call_operand.<no memory space> [shape: f32[1], index: 1, kind: input, shape index: {}]   ;;  %s134_s2 = inlined_call_operand.hbm [shape: f32[1,2048], index: 2, kind: output, shape index: {}]  }
   0x1   :  { %9 = vsyncpa [#allocation5], 0  ;;  %s15_s11 = sshll.u32 %s132_s0, 4  ;;  %s106_s12 = smov [#allocation3]   ;;  %s16_s11 = int_to_ptr.hbm [resolvable:$true] %s15_s11 }
   0x2   :  { %s17_s13 = sshll.u32 %s106_s12, 4  ;;  %s18_s13 = int_to_ptr.vmem [resolvable:$true] %s17_s13 }
   0x3   :  { %20 = dma.hbm_to_vmem [thread:$0]  %s16_s11, 256, %s18_s13, [#allocation4]  }
   0x4   :  { %102 = dma.done.wait [#allocation4], 256  }
   0x5   :  { %103 = vsyncadd [#allocation4], 4294967040  ;;  %v30_v0 = vstv %s133_s1  ;;  %s107_s16 = smov [#allocation6]   ;;  %s42_s20 = sshll.u32 %s134_s2, 4  ;;  %v27_v1 = vld [vmem:[#allocation3] sm:$0xff]  ;;  %v28_v2 = vld [vmem:[#allocation3 + $0x8] sm:$0xff]  ;;  %s43_s20 = int_to_ptr.hbm [resolvable:$true] %s42_s20 }
   0x6   :  { %s40_s17 = sshll.u32 %s107_s16, 4  ;;  %v31_v3 = vmul.f32 %v30_v0, %v27_v1  ;;  %v32_v4 = vmul.f32 %v30_v0, %v28_v2  ;;  %s41_s17 = int_to_ptr.vmem [resolvable:$true] %s40_s17 }
   0x8   :  { %33 = vst [vmem:[#allocation6] sm:$0xff] %v31_v3 }
   0x9   :  { %34 = vst [vmem:[#allocation6 + $0x8] sm:$0xff] %v32_v4 }
   0xa   :  { %45 = dma.vmem_to_hbm [thread:$0]  %s41_s17, 256, %s43_s20, [#allocation5]  }
   0xb   :  { %104 = dma.done.wait [#allocation5], 256  }
   0xc   :  { %105 = vsyncadd [#allocation5], 4294967040 }
   0xd   :  { %50 = vsyncpa [#allocation4], 1 }
   0xe   :  { %51 = vsyncpa [#allocation5], 1 }

</bundles_post_ra>
